<compile_context>
chip_gen: v7x
topology: tpu7x:2x2x1
jax: 0.10.0
libtpu: 0.0.40
codegen_flags: <defaults>
</compile_context>

<pallas_src>
import math
import functools

import jax
import jax.numpy as jnp
from jax import lax
from jax.experimental import pallas as pl
from jax.experimental.pallas import tpu as pltpu


def _metric_logits_kernel(mean_ref, x_ref, xsq_ref, w_ref, wsq_ref,
                          val_ref, train_ref):
    # mean_ref : (1, 1)   SMEM, precomputed mean(metric) over all B*C entries
    # x_ref    : (TB, D)  feature tile (matmul dtype), resident across class tiles
    # xsq_ref  : (TB, 1)  f32 ||x_i||^2
    # w_ref    : (TC, D)  weight tile in native [C, D] layout (matmul dtype)
    # wsq_ref  : (1, TC)  f32 ||w_c||^2
    # val_ref  : (TB, TC) valuation_logits tile = -metric
    # train_ref: (TB, TC) train_logits tile     = -(metric - mean(metric))
    #
    # NT matmul on the MXU: contract the feature dim of both operands so no
    # transpose of the weights is needed anywhere; class dim -> lanes.
    ip = lax.dot_general(
        x_ref[...], w_ref[...],
        dimension_numbers=(((1,), (1,)), ((), ())),
        preferred_element_type=jnp.float32)                  # (TB, TC), f32 accum
    # metric = ||x||^2 + ||w||^2 - 2 x.w   ->   valuation = -metric (one VPU pass)
    val = 2.0 * ip - xsq_ref[...] - wsq_ref[...]
    val_ref[...] = val.astype(val_ref.dtype)
    # train = -(metric - mean(metric)) = valuation + mean(metric)
    train_ref[...] = (val + mean_ref[0, 0]).astype(train_ref.dtype)


def _round_up(x, m):
    return ((x + m - 1) // m) * m


def _vmem_capacity_bytes():
    """Per-core VMEM capacity (128 MiB v5e/v6e, 64 MiB v7x), with a safe fallback."""
    try:
        info = pltpu.get_tpu_info()
        cap = int(getattr(info, "vmem_capacity_bytes", 0) or 0)
        if cap > 0:
            return cap
    except Exception:
        pass
    return 64 * 1024 * 1024  # conservative (v7x-sized) fallback


def _choose_tiles(B, C, D, mm_bytes, out_bytes, budget_bytes):
    """Pick (TB, TC).

    TB is a multiple of 8 (or == B); TC is a multiple of 128 (or == C when
    C <= 128).  Working-set model (Pallas double-buffers every block):
      resident over the class loop : feat (TB,D)@mm + xsq (TB,1)@f32
      streamed per class tile      : w (TC,D)@mm + wsq (1,TC)@f32
                                     + 2 outputs (TB,TC)@out
    """
    def fits(tb, tc):
        resident = 2 * (tb * D * mm_bytes + tb * 4)
        streamed = 2 * (tc * D * mm_bytes + tc * 4) + 2 * 2 * (tb * tc * out_bytes)
        return resident + streamed <= budget_bytes

    # Batch tile: the biggest affordable — halves weight re-streaming for large B
    # and amortizes the ~0.35us per-grid-step overhead. 256-multiples feed the
    # 2x256^2 MXUs on v6e/v7x; v5e's 128^2 MXU is happy with anything >= 128.
    if B <= 512:
        tb_cands = [B] + [t for t in (256, 128, 64, 32, 16, 8) if t < B]
    else:
        tb_cands = [512, 256, 128]

    # Class tile: multiple of 128 (prefer >= 256), bounded by C.
    if C <= 128:
        tc_cands = [C]
    else:
        c128 = _round_up(C, 128)
        tc_cands = [t for t in (4096, 2048, 1024, 512, 256, 128) if t <= c128]

    tb, tc = tb_cands[-1], tc_cands[-1]          # last-resort fallback
    for cand_tb in tb_cands:
        ok = [t for t in tc_cands if fits(cand_tb, t)]
        if ok:
            tb, tc = cand_tb, ok[0]
            break

    # v7x megacore: guarantee >= 2 "parallel" tiles so both TensorCores get work.
    # Cost on single-core chips is one extra grid step (sub-microsecond).
    if pl.cdiv(B, tb) * pl.cdiv(C, tc) == 1:
        if C >= 256:
            tc = _round_up((C + 1) // 2, 128)
        elif B >= 16:
            tb = _round_up((B + 1) // 2, 8)
    return tb, tc


def metric_logits_forward(feat, weights, label=None, *,
                          matmul_dtype=jnp.bfloat16,
                          out_dtype=jnp.float32):
    """Returns (train_logits, valuation_logits, weights) matching the torch module.

    matmul_dtype: bf16 (default) streams half the HBM bytes and gets full MXU
    throughput (f32 accumulation).  Use jnp.float32 for close parity with the
    f32 PyTorch module (the MXU still runs f32 as multiple bf16 passes, so
    bit-exactness with a CPU/GPU f32 matmul is not guaranteed).  Note the
    ||x||^2+||w||^2-2x.w expansion loses precision for x ~= w (near-zero
    distances), and more so with bf16 operands.
    out_dtype: dtype of the returned logits (bf16 halves the output-store /
    downstream traffic; changes the returned dtype, so gated behind this flag).
    """
    del label  # does not affect the returned tensors (see TODO below)

    B, D = feat.shape
    C, _ = weights.shape

    feat_f32 = feat.astype(jnp.float32)
    w_f32 = weights.astype(jnp.float32)

    # Tiny hoisted preprocessing (fuses into one pass over feat / weights under jit).
    x_sq = jnp.sum(feat_f32 * feat_f32, axis=-1, keepdims=True)       # (B, 1) f32
    w_sq = jnp.sum(w_f32 * w_f32, axis=-1)[None, :]                   # (1, C) f32

    # Global mean of the metric via the exact identity
    #   mean_{i,c} ||w_c - x_i||^2
    #     = mean_i ||x_i||^2 + mean_c ||w_c||^2 - 2 * mean_i(x_i) . mean_c(w_c)
    # so train_logits needs no extra pass over the [B, C] logits at all.
    metric_mean = (jnp.mean(x_sq) + jnp.mean(w_sq)
                   - 2.0 * jnp.dot(jnp.mean(feat_f32, axis=0),
                                   jnp.mean(w_f32, axis=0)))
    metric_mean = jnp.reshape(metric_mean, (1, 1)).astype(jnp.float32)

    # Cast the streamed matmul operands in the wrapper (saves HBM bytes); norms,
    # accumulation and the epilogue stay f32.
    feat_mm = feat.astype(matmul_dtype)
    w_mm = weights.astype(matmul_dtype)

    mm_bytes = jnp.dtype(matmul_dtype).itemsize
    out_bytes = jnp.dtype(out_dtype).itemsize

    vmem_cap = _vmem_capacity_bytes()
    tile_budget = int(vmem_cap * 0.45)                       # working-set target
    vmem_limit = min(int(vmem_cap * 0.65), vmem_cap - 4 * 1024 * 1024)

    TB, TC = _choose_tiles(B, C, D, mm_bytes, out_bytes, tile_budget)
    grid = (pl.cdiv(B, TB), pl.cdiv(C, TC))                  # uneven grid: no pads,
                                                             # no post-kernel slice

    valuation_logits, train_logits = pl.pallas_call(
        _metric_logits_kernel,
        out_shape=(jax.ShapeDtypeStruct((B, C), out_dtype),
                   jax.ShapeDtypeStruct((B, C), out_dtype)),
        grid=grid,
        in_specs=[
            pl.BlockSpec(memory_space=pltpu.MemorySpace.SMEM),   # mean(metric) scalar
            pl.BlockSpec((TB, D), lambda i, j: (i, 0)),          # feat (resident over j)
            pl.BlockSpec((TB, 1), lambda i, j: (i, 0)),          # ||x||^2
            pl.BlockSpec((TC, D), lambda i, j: (j, 0)),          # weights, native [C, D]
            pl.BlockSpec((1, TC), lambda i, j: (0, j)),          # ||w||^2
        ],
        out_specs=(
            pl.BlockSpec((TB, TC), lambda i, j: (i, j)),         # valuation_logits
            pl.BlockSpec((TB, TC), lambda i, j: (i, j)),         # train_logits
        ),
        compiler_params=pltpu.CompilerParams(
            dimension_semantics=("parallel", "parallel"),
            vmem_limit_bytes=vmem_limit,
        ),
    )(metric_mean, feat_mm, x_sq, w_mm, w_sq)

    # TODO(synk): the PyTorch forward also builds y_onehot (scatter of
    # 0.0001*(||w_0||-||x_i||)^2), sq_p_dist, and host-side python stats
    # (per-sample target distances, metric mean/std via .item()); none of them
    # affect the returned tensors, so they are omitted from the kernel.
    return train_logits, valuation_logits, weights


def _reference(feat, weights):
    """Pure-JAX reference mirroring the torch forward's returned tensors."""
    diff = weights[None, :, :] - feat[:, None, :]
    metric = jnp.sum(diff * diff, axis=-1)
    valuation_logits = -metric
    train_logits = -(metric - jnp.mean(metric))
    return train_logits, valuation_logits


if __name__ == "__main__":
    B, feature_dim, class_num = 8, 32, 128

    key = jax.random.PRNGKey(0)
    k_feat, k_w, k_lbl = jax.random.split(key, 3)

    feat = jax.random.normal(k_feat, (B, feature_dim), dtype=jnp.float32)

    # Deterministic xavier_uniform_ for weights [class_num, feature_dim]:
    # bound = sqrt(6 / (fan_in + fan_out)).
    bound = math.sqrt(6.0 / (feature_dim + class_num))
    weights = jax.random.uniform(k_w, (class_num, feature_dim),
                                 minval=-bound, maxval=bound, dtype=jnp.float32)

    label = jax.random.randint(k_lbl, (B,), 0, class_num, dtype=jnp.int32)

    ref_train, ref_val = _reference(feat, weights)

    # Default path: bf16-streamed operands, f32 accumulation / outputs.
    fwd_bf16 = jax.jit(metric_logits_forward)
    train_logits, valuation_logits, w_out = fwd_bf16(feat, weights, label)
    jax.block_until_ready((train_logits, valuation_logits, w_out))

    assert train_logits.shape == (B, class_num)
    assert valuation_logits.shape == (B, class_num)
    assert train_logits.dtype == jnp.float32
    # bf16 operand rounding on unnormalized distances -> looser tolerance here;
    # the f32 path below provides the tight parity check.
    assert jnp.allclose(valuation_logits, ref_val, atol=2e-1, rtol=5e-3), \
        "valuation_logits mismatch (bf16 path)"
    assert jnp.allclose(train_logits, ref_train, atol=2e-1, rtol=5e-3), \
        "train_logits mismatch (bf16 path)"
    assert jnp.array_equal(w_out, weights)

    # f32-streamed path: close parity with the f32 PyTorch module.
    fwd_f32 = jax.jit(functools.partial(metric_logits_forward,
                                        matmul_dtype=jnp.float32))
    train32, val32, _ = fwd_f32(feat, weights, label)
    jax.block_until_ready((train32, val32))
    assert jnp.allclose(val32, ref_val, atol=2e-3, rtol=1e-4), \
        "valuation_logits mismatch (f32 path)"
    assert jnp.allclose(train32, ref_train, atol=2e-3, rtol=1e-4), \
        "train_logits mismatch (f32 path)"

    print("KERNEL_OK")
</pallas_src>

<mosaic_0001>
module attributes {stable_mosaic.version = 11 : i64} {
  func.func @_metric_logits_kernel(%arg0: i32, %arg1: i32, %arg2: memref<1x1xf32, #tpu.memory_space<smem>>, %arg3: memref<8x32xbf16, #tpu.memory_space<vmem>>, %arg4: memref<8x1xf32, #tpu.memory_space<vmem>>, %arg5: memref<128x32xbf16, #tpu.memory_space<vmem>>, %arg6: memref<1x128xf32, #tpu.memory_space<vmem>>, %arg7: memref<8x128xf32, #tpu.memory_space<vmem>>, %arg8: memref<8x128xf32, #tpu.memory_space<vmem>>) attributes {dimension_semantics = [#tpu.dimension_semantics<parallel>, #tpu.dimension_semantics<parallel>], iteration_bounds = array<i64: 1, 1>, scalar_prefetch = 0 : i64, scratch_operands = 0 : i64, tpu.core_type = #tpu.core_type<tc>, window_params = [{transform_indices = @transform_0, window_bounds = array<i64: 1, 1>}, {transform_indices = @transform_1, window_bounds = array<i64: 8, 32>}, {transform_indices = @transform_2, window_bounds = array<i64: 8, 1>}, {transform_indices = @transform_3, window_bounds = array<i64: 128, 32>}, {transform_indices = @transform_4, window_bounds = array<i64: 1, 128>}, {transform_indices = @transform_5, window_bounds = array<i64: 8, 128>}, {transform_indices = @transform_6, window_bounds = array<i64: 8, 128>}]} {
    %c0 = arith.constant 0 : index
    %c0_0 = arith.constant 0 : index
    %0 = vector.load %arg3[%c0, %c0_0] : memref<8x32xbf16, #tpu.memory_space<vmem>>, vector<8x32xbf16>
    %c0_1 = arith.constant 0 : index
    %c0_2 = arith.constant 0 : index
    %1 = vector.load %arg5[%c0_1, %c0_2] : memref<128x32xbf16, #tpu.memory_space<vmem>>, vector<128x32xbf16>
    %cst = arith.constant dense<0.000000e+00> : vector<8x128xf32>
    %2 = tpu.matmul %0, %1, %cst {dimension_numbers = #tpu.dot_dimension_numbers<[1], [1], [0], [0], [0, 0, 1, 0], [], []>} : vector<8x32xbf16>, vector<128x32xbf16>, vector<8x128xf32> -> vector<8x128xf32>
    %cst_3 = arith.constant 2.000000e+00 : f32
    %3 = vector.broadcast %cst_3 : f32 to vector<8x128xf32>
    %4 = arith.mulf %3, %2 : vector<8x128xf32>
    %c0_4 = arith.constant 0 : index
    %c0_5 = arith.constant 0 : index
    %5 = vector.load %arg4[%c0_4, %c0_5] : memref<8x1xf32, #tpu.memory_space<vmem>>, vector<8x1xf32>
    %6 = vector.broadcast %5 : vector<8x1xf32> to vector<8x128xf32>
    %7 = arith.subf %4, %6 : vector<8x128xf32>
    %c0_6 = arith.constant 0 : index
    %c0_7 = arith.constant 0 : index
    %8 = vector.load %arg6[%c0_6, %c0_7] : memref<1x128xf32, #tpu.memory_space<vmem>>, vector<1x128xf32>
    %9 = vector.broadcast %8 : vector<1x128xf32> to vector<8x128xf32>
    %10 = arith.subf %7, %9 : vector<8x128xf32>
    %c0_8 = arith.constant 0 : index
    %c0_9 = arith.constant 0 : index
    %11 = vector.load %arg7[%c0_8, %c0_9] : memref<8x128xf32, #tpu.memory_space<vmem>>, vector<8x128xf32>
    tpu.vector_store %arg7[%c0_8, %c0_9], %10 {strides = array<i32>} : memref<8x128xf32, #tpu.memory_space<vmem>>, vector<8x128xf32>,
    %c0_10 = arith.constant 0 : index
    %c0_11 = arith.constant 0 : index
    %12 = memref.load %arg2[%c0_10, %c0_11] : memref<1x1xf32, #tpu.memory_space<smem>>
    %13 = vector.broadcast %12 : f32 to vector<8x128xf32>
    %14 = arith.addf %10, %13 : vector<8x128xf32>
    %c0_12 = arith.constant 0 : index
    %c0_13 = arith.constant 0 : index
    %15 = vector.load %arg8[%c0_12, %c0_13] : memref<8x128xf32, #tpu.memory_space<vmem>>, vector<8x128xf32>
    tpu.vector_store %arg8[%c0_12, %c0_13], %14 {strides = array<i32>} : memref<8x128xf32, #tpu.memory_space<vmem>>, vector<8x128xf32>,
    return
  }
  func.func @transform_0(%arg0: i32, %arg1: i32) -> (i32, i32) {
    %c0_i32 = arith.constant 0 : i32
    %c0_i32_0 = arith.constant 0 : i32
    %c0_i32_1 = arith.constant 0 : i32
    return %c0_i32, %c0_i32_0 : i32, i32
  }
  func.func @transform_1(%arg0: i32, %arg1: i32) -> (i32, i32) {
    %c0_i32 = arith.constant 0 : i32
    %c0_i32_0 = arith.constant 0 : i32
    return %arg0, %c0_i32 : i32, i32
  }
  func.func @transform_2(%arg0: i32, %arg1: i32) -> (i32, i32) {
    %c0_i32 = arith.constant 0 : i32
    %c0_i32_0 = arith.constant 0 : i32
    return %arg0, %c0_i32 : i32, i32
  }
  func.func @transform_3(%arg0: i32, %arg1: i32) -> (i32, i32) {
    %c0_i32 = arith.constant 0 : i32
    %c0_i32_0 = arith.constant 0 : i32
    return %arg1, %c0_i32 : i32, i32
  }
  func.func @transform_4(%arg0: i32, %arg1: i32) -> (i32, i32) {
    %c0_i32 = arith.constant 0 : i32
    %c0_i32_0 = arith.constant 0 : i32
    return %c0_i32, %arg1 : i32, i32
  }
  func.func @transform_5(%arg0: i32, %arg1: i32) -> (i32, i32) {
    %c0_i32 = arith.constant 0 : i32
    return %arg0, %arg1 : i32, i32
  }
  func.func @transform_6(%arg0: i32, %arg1: i32) -> (i32, i32) {
    %c0_i32 = arith.constant 0 : i32
    return %arg0, %arg1 : i32, i32
  }
}

</mosaic_0001>

<bundles_post_ra>
// kernel: metric_logits_forward.1
= control target key start
LH: loop header
LB: loop body
LE: loop exit
PB: predicated region body
PF: predicated region fallthrough
CT: control target
= control target key end

     0   :  { %13 = vsyncpa [#allocation4], 0  ;;  %v301_v1 = vmov 0.0   ;;  %vm83_vm0 = vcmask 261120   ;;  %vm302_vm1 = vmmov 0   ;;  %v303_v6 = vmov 0   ;;  %s410_s0 = inlined_call_operand.<no memory space> [shape: f32[1,1], index: 0, kind: input, shape index: {}]   ;;  %s411_s1 = inlined_call_operand.vmem [shape: bf16[8,32], index: 1, kind: input, shape index: {}]   ;;  %s412_s2 = inlined_call_operand.vmem [shape: f32[8,1], index: 2, kind: input, shape index: {}]   ;;  %s413_s3 = inlined_call_operand.vmem [shape: bf16[128,32], index: 3, kind: input, shape index: {}]   ;;  %s414_s4 = inlined_call_operand.vmem [shape: f32[1,128], index: 4, kind: input, shape index: {}]   ;;  %s415_s5 = inlined_call_operand.hbm [shape: f32[8,128], index: 5, kind: output, shape index: {0}]   ;;  %s416_s6 = inlined_call_operand.hbm [shape: f32[8,128], index: 6, kind: output, shape index: {1}]  }
   0x1   :  { %v245_v0 = vld [vmem:[%s413_s3] sm:$0xff]   ;;  %219 = vmatprep.subr.bf16.mxu0 %v301_v1  ;;  %v246_v3 = vld [vmem:[%s413_s3 + $0x8] sm:$0xff]   ;;  %235 = vmatprep.mubr.msk.bf16.mxu0 %vm302_vm1, %v301_v1 }
   0x2   :  { %v88_v2 = vsel %vm83_vm0, %v245_v0, 0  ;;  %v91_v4 = vsel %vm83_vm0, %v246_v3, 0  ;;  %v152_v5 = vld [vmem:[%s412_s2] sm:$0xff]  ;;  %244 = vset.pattern.permute.xlu0 %v303_v6 }
   0x3   :  { %220 = vmatpush3.bf16.xpose.msra.mxu0 %v88_v2 }
   0x4   :  { %221 = vmatprep.subr.bf16.mxu0 %v301_v1 }
   0x5   :  { %14 = vsyncpa [#allocation6], 0  ;;  %155 = vperm.xlu0 %244, %v152_v5   ;;  %v247_v7 = vld [vmem:[%s413_s3 + $0x10] sm:$0xff]   ;;  %v248_v9 = vld [vmem:[%s413_s3 + $0x18] sm:$0xff]   ;;  %s304_s18 = smov [#allocation3]   ;;  %v169_v28 = vstv %s410_s0 }
   0x6   :  { %v94_v8 = vsel %vm83_vm0, %v247_v7, 0  ;;  %v97_v10 = vsel %vm83_vm0, %v248_v9, 0  ;;  %v249_v11 = vld [vmem:[%s413_s3 + $0x20] sm:$0xff]   ;;  %v250_v13 = vld [vmem:[%s413_s3 + $0x28] sm:$0xff]   ;;  %v251_v15 = vld [vmem:[%s413_s3 + $0x30] sm:$0xff]  }
   0x7   :  { %v100_v12 = vsel %vm83_vm0, %v249_v11, 0  ;;  %v103_v14 = vsel %vm83_vm0, %v250_v13, 0  ;;  %v106_v16 = vsel %vm83_vm0, %v251_v15, 0  ;;  %v252_v17 = vld [vmem:[%s413_s3 + $0x38] sm:$0xff]   ;;  %v26_v19 = vld [vmem:[%s411_s1] sm:$0xf] }
   0x8   :  { %v109_v18 = vsel %vm83_vm0, %v252_v17, 0  ;;  %v209_v25 = vld [vmem:[%s414_s4] ss:$0 sm:$0xff]  ;;  %s178_s3 = sshll.u32 %s304_s18, 4  ;;  %s305_s1 = smov [#allocation5]   ;;  %s179_s3 = int_to_ptr.vmem [resolvable:$true] %s178_s3 }
   0x9   :  { %s188_s21 = sshll.u32 %s305_s1, 4  ;;  %s253_s22 = scalar_lea.vmem %s179_s3, 128  ;;  %s189_s21 = int_to_ptr.vmem [resolvable:$true] %s188_s21 }
   0xa   :  { %p254_p0 = scmp.ne.s32.totalorder %s179_s3, %s253_s22  ;;  %p258_p1 = scmp.lt.s32.totalorder %s179_s3, %s179_s3 }
   0xb   :  { %222 = vmatpush3.bf16.xpose.msra.mxu0 %v91_v4  ;;  %p259_p2 = scmp.lt.s32.totalorder %s253_s22, %s253_s22 }
   0xc   :  { %223 = vmatprep.subr.bf16.mxu0 %v301_v1 }
   0xd   :  { %p260_p3 = por %p259_p2, %p258_p1 }
   0xf   :  { %p261_p4 = pnand %p260_p3, %p254_p0 }
  0x13   :  { %224 = vmatpush3.bf16.xpose.msra.mxu0 %v94_v8 }
  0x14   :  { %225 = vmatprep.subr.bf16.mxu0 %v301_v1 }
  0x1b   :  { %226 = vmatpush3.bf16.xpose.msra.mxu0 %v97_v10 }
  0x1c   :  { %227 = vmatprep.subr.bf16.mxu0 %v301_v1 }
  0x23   :  { %228 = vmatpush3.bf16.xpose.msra.mxu0 %v100_v12 }
  0x24   :  { %229 = vmatprep.subr.bf16.mxu0 %v301_v1 }
  0x2b   :  { %230 = vmatpush3.bf16.xpose.msra.mxu0 %v103_v14 }
  0x2c   :  { %231 = vmatprep.subr.bf16.mxu0 %v301_v1 }
  0x33   :  { %232 = vmatpush3.bf16.xpose.msra.mxu0 %v106_v16 }
  0x34   :  { %233 = vmatprep.subr.bf16.mxu0 %v301_v1 }
  0x3b   :  { %234 = vmatpush3.bf16.xpose.msra.mxu0 %v109_v18 }
  0x42   :  { %236 = vmatmul.mubr.msk.bf16.vlgmr.msra.gmra.mrb[0].mxu0 %vm83_vm0, %v26_v19 }
  0x84   :  { %v156_v21 = vpop.permute.xlu0 %155 }
 0x115   :  { %v145_v20 = vpop.f32.mrb[0].mxu0 }
 0x116   :  { %v151_v22 = vmul.f32 2.0, %v145_v20  ;;  %v237_v23 = vpop.f32.mrb[1].mxu0 }
 0x117   :  { %v148_v24 = vpop.f32.mrb[2].mxu0 }
 0x118   :  { %v158_v26 = vsub.f32 %v151_v22, %v156_v21  ;;  %v238_v27 = vpop.f32.mrb[3].mxu0 }
 0x11a   :  { %v166_v29 = vsub.f32 %v158_v26, %v209_v25 }
 0x11c   :  { %167 = vst [vmem:[#allocation3] sm:$0xff] %v166_v29  ;;  %v170_v30 = vadd.f32 %v169_v28, %v166_v29 }
 0x11d   :  { %264 = shalt.err (!%p261_p4)
}
 0x11e   :  { %s265_s24 = scalar_lea.hbm %s415_s5, 128 }
 0x11f   :  { %p266_p5 = scmp.ne.s32.totalorder %s415_s5, %s265_s24  ;;  %p269_p6 = scmp.lt.u32.totalorder %s265_s24, %s415_s5 }
 0x121   :  { %p271_p7 = pnand %p269_p6, %p266_p5 }
 0x123   :  { %274 = shalt.err (!%p271_p7)
}
 0x124   :  { %181 = dma.vmem_to_hbm [thread:$0]  %s179_s3, 128, %s415_s5, [#allocation4]   ;;  %171 = vst [vmem:[#allocation5] sm:$0xff] %v170_v30 }
 0x125   :  { %s275_s30 = scalar_lea.vmem %s189_s21, 128  ;;  %p280_p9 = scmp.lt.s32.totalorder %s189_s21, %s189_s21 }
 0x126   :  { %p276_p8 = scmp.ne.s32.totalorder %s189_s21, %s275_s30  ;;  %p281_p10 = scmp.lt.s32.totalorder %s275_s30, %s275_s30 }
 0x128   :  { %p282_p11 = por %p281_p10, %p280_p9 }
 0x12a   :  { %p283_p12 = pnand %p282_p11, %p276_p8 }
 0x12c   :  { %286 = shalt.err (!%p283_p12)
}
 0x12d   :  { %s287_s8 = scalar_lea.hbm %s416_s6, 128 }
 0x12e   :  { %p288_p13 = scmp.ne.s32.totalorder %s416_s6, %s287_s8  ;;  %p291_p0 = scmp.lt.u32.totalorder %s287_s8, %s416_s6 }
 0x130   :  { %p293_p1 = pnand %p291_p0, %p288_p13 }
 0x132   :  { %296 = shalt.err (!%p293_p1)
}
 0x133   :  { %191 = dma.vmem_to_hbm [thread:$0]  %s189_s21, 128, %s416_s6, [#allocation6]  }
 0x134   :  { %297 = dma.done.wait [#allocation4], 128  }
 0x135   :  { %298 = vsyncadd [#allocation4], 4294967168 }
 0x136   :  { %299 = dma.done.wait [#allocation6], 128  }
 0x137   :  { %300 = vsyncadd [#allocation6], 4294967168 }
 0x138   :  { %198 = vsyncpa [#allocation4], 1 }
 0x139   :  { %199 = vsyncpa [#allocation6], 1 }

</bundles_post_ra>
